<compile_context>
chip_gen: v7x
topology: tpu7x:2x2x1
jax: 0.10.0
libtpu: 0.0.40
codegen_flags: <defaults>
</compile_context>

<pallas_src>
import functools

import jax
import jax.numpy as jnp
from jax import lax
from jax.experimental import pallas as pl
from jax.experimental.pallas import tpu as pltpu

_MIB = 1 << 20
_N_INFLIGHT = 8              # concurrent row DMAs for the HBM-gather path
_SMALL_VOCAB = 2048          # one-hot fast path only below this vocab size
_SMALL_TABLE_BYTES = 4 * _MIB


def _vmem_budget(needed_bytes: int) -> int:
    # Never shrink below the default scoped limit; cap at v7x physical VMEM.
    return int(min(64 * _MIB, max(32 * _MIB, needed_bytes)))


# ---------------------------------------------------------------------------
# Path A (default): HBM-resident table + scalar-prefetched ids driving a
# windowed async-copy row gather.
# ---------------------------------------------------------------------------
def _gather_kernel(ids_ref, table_ref, out_ref, buf, sem, *, vocab, scale, tm):
    # ids_ref  : SMEM int32 [n_tokens_padded]   (scalar-prefetched)
    # table_ref: HBM  [vocab, D]                (memory_space=pl.ANY)
    # out_ref  : VMEM [tm, D]                   (lane-dense output tile)
    # buf      : VMEM [tm, D] scratch           (gather destination)
    # sem      : DMA semaphore array [_N_INFLIGHT]
    base = pl.program_id(0) * tm

    def issue(j):
        # Clamp so an out-of-range id never drives an OOB DMA (PyTorch raises;
        # we clamp — documented semantic difference).
        row = jnp.clip(ids_ref[base + j], 0, vocab - 1)
        pltpu.make_async_copy(table_ref.at[pl.ds(row, 1), :],
                              buf.at[pl.ds(j, 1), :],
                              sem.at[j % _N_INFLIGHT]).start()

    # Prime the DMA window.
    for j in range(min(_N_INFLIGHT, tm)):
        issue(j)

    @pl.loop(0, tm)
    def _(j):
        # Wait for row j (slot j % window), then reuse its slot for row j+window.
        pltpu.make_async_copy(table_ref.at[pl.ds(0, 1), :],
                              buf.at[pl.ds(0, 1), :],
                              sem.at[j % _N_INFLIGHT]).wait()

        @pl.when(j + _N_INFLIGHT < tm)
        def _():
            issue(j + _N_INFLIGHT)

    # Single lane-dense, unmasked store of the whole tile, scaled by sqrt(D).
    out_ref[...] = (buf[...] * scale).astype(out_ref.dtype)


def _gather_path(ids_flat, emb_table, tm):
    n_padded = ids_flat.shape[0]
    vocab, embed_dim = emb_table.shape
    itemsize = emb_table.dtype.itemsize
    scale = float(embed_dim) ** 0.5

    tile_bytes = tm * embed_dim * itemsize
    vmem_limit = _vmem_budget(3 * tile_bytes + 2 * _MIB)   # buf + 2x out tile

    kernel = functools.partial(_gather_kernel, vocab=vocab, scale=scale, tm=tm)

    return pl.pallas_call(
        kernel,
        out_shape=jax.ShapeDtypeStruct((n_padded, embed_dim), emb_table.dtype),
        grid_spec=pltpu.PrefetchScalarGridSpec(
            num_scalar_prefetch=1,                          # ids -> SMEM
            grid=(n_padded // tm,),
            in_specs=[pl.BlockSpec(memory_space=pl.ANY)],   # table stays in HBM
            out_specs=pl.BlockSpec((tm, embed_dim), lambda i, ids: (i, 0)),
            scratch_shapes=[
                pltpu.VMEM((tm, embed_dim), emb_table.dtype),
                pltpu.SemaphoreType.DMA((_N_INFLIGHT,)),
            ],
        ),
        compiler_params=pltpu.CompilerParams(
            dimension_semantics=("parallel",),
            vmem_limit_bytes=vmem_limit,
        ),
        cost_estimate=pl.CostEstimate(
            flops=n_padded * embed_dim,                     # just the scale mul
            transcendentals=0,
            bytes_accessed=2 * n_padded * embed_dim * itemsize + n_padded * 4,
        ),
    )(ids_flat, emb_table)


# ---------------------------------------------------------------------------
# Path B (small-vocab fast path): one-hot MXU gather against a VMEM-resident,
# single-buffered table, with sqrt(D) folded into the one-hot values.
# ---------------------------------------------------------------------------
def _onehot_kernel(ids_ref, table_ref, out_ref, *, vocab, scale):
    tm = out_ref.shape[0]
    ids = jnp.clip(ids_ref[...], 0, vocab - 1)                      # (tm, 1)
    col = lax.broadcasted_iota(jnp.int32, (tm, vocab), 1)           # (tm, V)
    # Fold sqrt(D) into the one-hot: the MXU applies the scale exactly.
    one_hot = jnp.where(ids == col, jnp.float32(scale), jnp.float32(0.0))
    table = table_ref[...]
    if table.dtype != jnp.float32:
        table = table.astype(jnp.float32)   # keep the single-row select exact
    out = jnp.dot(one_hot, table, preferred_element_type=jnp.float32)
    out_ref[...] = out.astype(out_ref.dtype)


def _onehot_path(ids_col, emb_table, tm):
    n_padded = ids_col.shape[0]
    vocab, embed_dim = emb_table.shape
    itemsize = emb_table.dtype.itemsize
    scale = float(embed_dim) ** 0.5

    table_bytes = vocab * embed_dim * itemsize
    tile_bytes = tm * embed_dim * itemsize
    onehot_bytes = tm * vocab * 4
    vmem_limit = _vmem_budget(2 * table_bytes + 2 * tile_bytes
                              + 2 * onehot_bytes + 2 * _MIB)

    kernel = functools.partial(_onehot_kernel, vocab=vocab, scale=scale)

    return pl.pallas_call(
        kernel,
        out_shape=jax.ShapeDtypeStruct((n_padded, embed_dim), emb_table.dtype),
        grid_spec=pltpu.PrefetchScalarGridSpec(
            num_scalar_prefetch=0,
            grid=(n_padded // tm,),
            in_specs=[
                pl.BlockSpec((tm, 1), lambda i: (i, 0)),
                # Constant-index table block: fetched once, single-buffered.
                pl.BlockSpec((vocab, embed_dim), lambda i: (0, 0),
                             pipeline_mode=pl.Buffered(1)),
            ],
            out_specs=pl.BlockSpec((tm, embed_dim), lambda i: (i, 0)),
        ),
        compiler_params=pltpu.CompilerParams(
            dimension_semantics=("parallel",),
            vmem_limit_bytes=vmem_limit,
        ),
        cost_estimate=pl.CostEstimate(
            flops=n_padded * embed_dim,
            transcendentals=0,
            bytes_accessed=2 * n_padded * embed_dim * itemsize + table_bytes,
        ),
    )(ids_col, emb_table)


# ---------------------------------------------------------------------------
# Public wrapper.
# ---------------------------------------------------------------------------
def standard_word_embedding(input_ids: jax.Array, emb_table: jax.Array,
                            *, tokens_per_tile: int = 512,
                            use_hbm_gather: bool | None = None) -> jax.Array:
    """Pallas equivalent of StandardWordEmbedding.forward.

    input_ids: int array (batch, seq); emb_table: (num_embeddings, embedding_dim)
    returns (batch, seq, embedding_dim) = emb_table[input_ids] * sqrt(embedding_dim)
    """
    batch, seq = input_ids.shape
    vocab, embed_dim = emb_table.shape

    ids_flat = input_ids.reshape(-1).astype(jnp.int32)
    n_tokens = ids_flat.shape[0]

    # Big lane-dense tiles (raise tokens_per_tile to 1024 on v7x); shrink to a
    # multiple of 8 for tiny inputs so the single tile is not mostly padding.
    if n_tokens >= tokens_per_tile:
        tm = tokens_per_tile
    else:
        tm = max(8, -(-n_tokens // 8) * 8)
    n_padded = -(-n_tokens // tm) * tm
    if n_padded != n_tokens:
        ids_flat = jnp.pad(ids_flat, (0, n_padded - n_tokens))

    table_bytes = vocab * embed_dim * emb_table.dtype.itemsize
    if use_hbm_gather is None:
        # HBM row gather is the default for anything but toy tables (and is
        # mandatory for sizes that cannot fit v7x's 64 MiB VMEM).
        use_hbm_gather = (vocab > _SMALL_VOCAB) or (table_bytes > _SMALL_TABLE_BYTES)

    if use_hbm_gather:
        out_flat = _gather_path(ids_flat, emb_table, tm)
    else:
        out_flat = _onehot_path(ids_flat.reshape(n_padded, 1), emb_table, tm)

    return out_flat[:n_tokens].reshape(batch, seq, embed_dim)


if __name__ == "__main__":
    # Small, deterministic setup consistent with the module's __init__.
    num_embeddings = 64      # vocab size
    embedding_dim = 128      # hidden size (lane-dense)
    batch, seq = 2, 8

    key = jax.random.PRNGKey(0)
    k_emb, k_ids = jax.random.split(key)

    emb_table = jax.random.normal(
        k_emb, (num_embeddings, embedding_dim), dtype=jnp.float32)
    input_ids = jax.random.randint(
        k_ids, (batch, seq), 0, num_embeddings, dtype=jnp.int32)

    ref = emb_table[input_ids] * (embedding_dim ** 0.5)

    # Path B: small-vocab fast path (one-hot MXU, single-buffered VMEM table).
    out_fast = jax.block_until_ready(standard_word_embedding(input_ids, emb_table))
    assert out_fast.shape == (batch, seq, embedding_dim)
    assert jnp.allclose(out_fast, ref, atol=1e-4, rtol=1e-5), \
        float(jnp.max(jnp.abs(out_fast - ref)))

    # Path A: HBM-resident table + scalar-prefetch-driven DMA row gather,
    # forced here so the default/large-vocab path is exercised too; the small
    # tile gives multiple grid steps, DMA-window wrap and ragged-tail padding.
    batch2, seq2 = 3, 13     # 39 tokens -> tm=16 -> 3 tiles, 9 padded tokens
    k_ids2 = jax.random.fold_in(k_ids, 1)
    input_ids2 = jax.random.randint(
        k_ids2, (batch2, seq2), 0, num_embeddings, dtype=jnp.int32)
    ref2 = emb_table[input_ids2] * (embedding_dim ** 0.5)

    out_gather = jax.block_until_ready(
        standard_word_embedding(input_ids2, emb_table,
                                tokens_per_tile=16, use_hbm_gather=True))
    assert out_gather.shape == (batch2, seq2, embedding_dim)
    assert jnp.allclose(out_gather, ref2, atol=1e-4, rtol=1e-5), \
        float(jnp.max(jnp.abs(out_gather - ref2)))

    print("KERNEL_OK")
</pallas_src>

<mosaic_0001>
module attributes {stable_mosaic.version = 11 : i64} {
  func.func @_onehot_kernel(%arg0: i32, %arg1: memref<16x1xi32, #tpu.memory_space<vmem>>, %arg2: memref<64x128xf32, #tpu.memory_space<vmem>>, %arg3: memref<16x128xf32, #tpu.memory_space<vmem>>) attributes {dimension_semantics = [#tpu.dimension_semantics<parallel>], iteration_bounds = array<i64: 1>, scalar_prefetch = 0 : i64, scratch_operands = 0 : i64, tpu.core_type = #tpu.core_type<tc>, window_params = [{transform_indices = @transform_0, window_bounds = array<i64: 16, 1>}, {pipeline_mode = #tpu.pipeline_mode<synchronous>, transform_indices = @transform_1, window_bounds = array<i64: 64, 128>}, {transform_indices = @transform_2, window_bounds = array<i64: 16, 128>}]} {
    %c0 = arith.constant 0 : index
    %c0_0 = arith.constant 0 : index
    %0 = vector.load %arg1[%c0, %c0_0] : memref<16x1xi32, #tpu.memory_space<vmem>>, vector<16x1xi32>
    %c0_i32 = arith.constant 0 : i32
    %c63_i32 = arith.constant 63 : i32
    %1 = vector.broadcast %c0_i32 : i32 to vector<16x1xi32>
    %2 = arith.maxsi %1, %0 : vector<16x1xi32>
    %3 = vector.broadcast %c63_i32 : i32 to vector<16x1xi32>
    %4 = arith.minsi %3, %2 : vector<16x1xi32>
    %5 = tpu.iota {dimensions = array<i32: 1>} : vector<16x64xi32>
    %6 = vector.broadcast %4 : vector<16x1xi32> to vector<16x64xi32>
    %7 = arith.cmpi eq, %6, %5 : vector<16x64xi32>
    %cst = arith.constant 11.3137083 : f32
    %cst_1 = arith.constant 0.000000e+00 : f32
    %8 = vector.broadcast %cst : f32 to vector<16x64xf32>
    %9 = vector.broadcast %cst_1 : f32 to vector<16x64xf32>
    %10 = arith.select %7, %8, %9 : vector<16x64xi1>, vector<16x64xf32>
    %c0_2 = arith.constant 0 : index
    %c0_3 = arith.constant 0 : index
    %11 = vector.load %arg2[%c0_2, %c0_3] : memref<64x128xf32, #tpu.memory_space<vmem>>, vector<64x128xf32>
    %cst_4 = arith.constant dense<0.000000e+00> : vector<16x128xf32>
    %12 = tpu.matmul %10, %11, %cst_4 {dimension_numbers = #tpu.dot_dimension_numbers<[1], [0], [0], [1], [0, 0, 1, 1], [], []>} : vector<16x64xf32>, vector<64x128xf32>, vector<16x128xf32> -> vector<16x128xf32>
    %c0_5 = arith.constant 0 : index
    %c0_6 = arith.constant 0 : index
    %13 = vector.load %arg3[%c0_5, %c0_6] : memref<16x128xf32, #tpu.memory_space<vmem>>, vector<16x128xf32>
    tpu.vector_store %arg3[%c0_5, %c0_6], %12 {strides = array<i32>} : memref<16x128xf32, #tpu.memory_space<vmem>>, vector<16x128xf32>,
    return
  }
  func.func @transform_0(%arg0: i32) -> (i32, i32) {
    %c0_i32 = arith.constant 0 : i32
    %c0_i32_0 = arith.constant 0 : i32
    return %arg0, %c0_i32 : i32, i32
  }
  func.func @transform_1(%arg0: i32) -> (i32, i32) {
    %c0_i32 = arith.constant 0 : i32
    %c0_i32_0 = arith.constant 0 : i32
    %c0_i32_1 = arith.constant 0 : i32
    return %c0_i32, %c0_i32_0 : i32, i32
  }
  func.func @transform_2(%arg0: i32) -> (i32, i32) {
    %c0_i32 = arith.constant 0 : i32
    %c0_i32_0 = arith.constant 0 : i32
    return %arg0, %c0_i32 : i32, i32
  }
}

</mosaic_0001>

<bundles_post_ra>
// kernel: tpu_custom_call.1
= control target key start
LH: loop header
LB: loop body
LE: loop exit
PB: predicated region body
PF: predicated region fallthrough
CT: control target
= control target key end

     0   :  { %7 = vsyncpa [#allocation3], 0  ;;  %s316_s0 = inlined_call_operand.vmem [shape: s32[16,1], index: 0, kind: input, shape index: {}]   ;;  %s317_s1 = inlined_call_operand.hbm [shape: f32[64,128], index: 1, kind: input, shape index: {}]   ;;  %s318_s2 = inlined_call_operand.hbm [shape: f32[16,128], index: 2, kind: output, shape index: {}]  }
   0x1   :  { %8 = vsyncpa [#allocation4], 0  ;;  %s259_s9 = smov [#allocation2]   ;;  %s211_s13 = scalar_lea.hbm %s317_s1, 1024 }
   0x2   :  { %s16_s10 = sshll.u32 %s259_s9, 4  ;;  %p212_p0 = scmp.ne.s32.totalorder %s317_s1, %s211_s13  ;;  %s17_s10 = int_to_ptr.vmem [resolvable:$true] %s16_s10 }
   0x3   :  { %p215_p1 = scmp.lt.u32.totalorder %s211_s13, %s317_s1 }
   0x5   :  { %p217_p2 = pnand %p215_p1, %p212_p0 }
   0x7   :  { %220 = shalt.err (!%p217_p2)
}
   0x8   :  { %s221_s18 = scalar_lea.vmem %s17_s10, 1024  ;;  %p226_p4 = scmp.lt.s32.totalorder %s17_s10, %s17_s10 }
   0x9   :  { %p222_p3 = scmp.ne.s32.totalorder %s17_s10, %s221_s18  ;;  %p227_p5 = scmp.lt.s32.totalorder %s221_s18, %s221_s18 }
   0xb   :  { %p228_p6 = por %p227_p5, %p226_p4 }
   0xd   :  { %p229_p7 = pnand %p228_p6, %p222_p3 }
   0xf   :  { %232 = shalt.err (!%p229_p7)
}
  0x10   :  { %s260_s19 = smov 128   ;;  %s261_s20 = smov 8  }
  0x11   :  { %22 = dma.hbm_to_vmem [thread:$0]  %s317_s1, 1024, %s17_s10, [#allocation3], %s260_s19, %s260_s19, %s261_s20  }
  0x12   :  { %255 = dma.done.wait [#allocation3], 1024  }
  0x13   :  { %256 = vsyncadd [#allocation3], 4294966272  ;;  %v262_v0 = vmov 0   ;;  %v26_v1 = vld [vmem:[%s316_s0] sm:$0xff]  ;;  %v27_v2 = vld [vmem:[%s316_s0 + $0x8] sm:$0xff]  ;;  %v36_v19 = vlaneseq  ;;  %vm56_vm4 = vcmask 523264  }
  0x14   :  { %210 = vset.pattern.permute.xlu0 %v262_v0  ;;  %v48_v3 = vld [vmem:[#allocation2] sm:$0xff]  ;;  %vm28_vm0 = vcmp.gt.s32.totalorder %v26_v1, 0  ;;  %vm30_vm1 = vcmp.gt.s32.totalorder %v27_v2, 0  ;;  %v49_v4 = vld [vmem:[#allocation2 + $0x8] sm:$0xff]  ;;  %v50_v5 = vld [vmem:[#allocation2 + $0x10] sm:$0xff]  ;;  %v263_v22 = vmov 0.0  }
  0x15   :  { %v51_v6 = vld [vmem:[#allocation2 + $0x18] sm:$0xff]  ;;  %v29_v7 = vsel %vm28_vm0, %v26_v1, 0  ;;  %v31_v8 = vsel %vm30_vm1, %v27_v2, 0  ;;  %v188_v9 = vpack.c.bf16 %v49_v4, %v48_v3  ;;  %v52_v11 = vld [vmem:[#allocation2 + $0x20] sm:$0xff]  ;;  %v53_v12 = vld [vmem:[#allocation2 + $0x28] sm:$0xff]  ;;  %v37_v20 = vand.u32 127, %v36_v19 }
  0x16   :  { %v192_v10 = vpack.c.bf16 %v51_v6, %v50_v5  ;;  %vm32_vm2 = vcmp.lt.s32.totalorder %v29_v7, 63  ;;  %vm34_vm3 = vcmp.lt.s32.totalorder %v31_v8, 63  ;;  %v196_v15 = vpack.c.bf16 %v53_v12, %v52_v11  ;;  %v54_v16 = vld [vmem:[#allocation2 + $0x30] sm:$0xff]  ;;  %v55_v17 = vld [vmem:[#allocation2 + $0x38] sm:$0xff]  ;;  %s264_s0 = smov [#allocation5]  }
  0x17   :  { %v33_v13 = vsel %vm32_vm2, %v29_v7, 63  ;;  %189 = vmatprep.subr.bf16.mxu0 %v188_v9  ;;  %v35_v14 = vsel %vm34_vm3, %v31_v8, 63  ;;  %v200_v18 = vpack.c.bf16 %v55_v17, %v54_v16  ;;  %s145_s1 = sshll.u32 %s264_s0, 4  ;;  %s146_s1 = int_to_ptr.vmem [resolvable:$true] %s145_s1 }
  0x18   :  { %39 = vperm.xlu0 %210, %v33_v13   ;;  %191 = vmatpush3.bf16.msra.mxu0 %v188_v9  ;;  %s233_s27 = scalar_lea.vmem %s146_s1, 256  ;;  %p238_p9 = scmp.lt.s32.totalorder %s146_s1, %s146_s1 }
  0x19   :  { %193 = vmatprep.subr.bf16.mxu0 %v192_v10  ;;  %p234_p8 = scmp.ne.s32.totalorder %s146_s1, %s233_s27  ;;  %p239_p10 = scmp.lt.s32.totalorder %s233_s27, %s233_s27 }
  0x1b   :  { %p240_p11 = por %p239_p10, %p238_p9 }
  0x1c   :  { %42 = vperm.xlu0 %210, %v35_v14   ;;  %195 = vmatpush3.bf16.msra.mxu0 %v192_v10 }
  0x1d   :  { %197 = vmatprep.subr.bf16.mxu0 %v196_v15  ;;  %p241_p12 = pnand %p240_p11, %p234_p8 }
  0x20   :  { %199 = vmatpush3.bf16.msra.mxu0 %v196_v15 }
  0x21   :  { %201 = vmatprep.subr.bf16.mxu0 %v200_v18 }
  0x24   :  { %203 = vmatpush3.bf16.msra.mxu0 %v200_v18 }
  0x97   :  { %v40_v21 = vpop.permute.xlu0 %39 }
  0x98   :  { %vm44_vm5 = vcmp.eq.s32.totalorder %v40_v21, %v37_v20 }
  0x99   :  { %v46_v23 = vsel %vm44_vm5, 11.313708, %v263_v22 }
  0x9a   :  { %185 = vmatprep.mubr.msk.f32.mxu0 %vm56_vm4, %v46_v23 }
  0x9b   :  { %v43_v24 = vpop.permute.xlu0 %42 }
  0x9c   :  { %vm45_vm6 = vcmp.eq.s32.totalorder %v43_v24, %v37_v20 }
  0x9d   :  { %v47_v25 = vsel %vm45_vm6, 11.313708, %v263_v22 }
  0x9e   :  { %186 = vmatmul.mubr.msk.f32.vlgmr.msra.gmra.mrb[0].mxu0 %vm56_vm4, %v47_v25 }
 0x171   :  { %v187_v26 = vpop.f32.mrb[0].mxu0 }
 0x172   :  { %139 = vst [vmem:[#allocation5 + $0x8] sm:$0xff] %v187_v26  ;;  %v129_v27 = vpop.f32.mrb[1].mxu0 }
 0x173   :  { %138 = vst [vmem:[#allocation5] sm:$0xff] %v129_v27 }
 0x174   :  { %244 = shalt.err (!%p241_p12)
}
 0x175   :  { %s245_s30 = scalar_lea.hbm %s318_s2, 256 }
 0x176   :  { %p246_p13 = scmp.ne.s32.totalorder %s318_s2, %s245_s30  ;;  %p249_p0 = scmp.lt.u32.totalorder %s245_s30, %s318_s2 }
 0x178   :  { %p251_p1 = pnand %p249_p0, %p246_p13 }
 0x17a   :  { %254 = shalt.err (!%p251_p1)
}
 0x17b   :  { %151 = dma.vmem_to_hbm [thread:$0]  %s146_s1, 256, %s318_s2, [#allocation4], %s260_s19, %s260_s19, %s261_s20  }
 0x17c   :  { %257 = dma.done.wait [#allocation4], 256  }
 0x17d   :  { %258 = vsyncadd [#allocation4], 4294967040 }
 0x17e   :  { %155 = vsyncpa [#allocation3], 1 }
 0x17f   :  { %156 = vsyncpa [#allocation4], 1 }

</bundles_post_ra>
